<compile_context>
chip_gen: v5e
topology: v5e:2x2
jax: 0.10.0
libtpu: 0.0.40
codegen_flags: <defaults>
</compile_context>

<pallas_src>
import functools

import jax
import jax.numpy as jnp
from jax.experimental import pallas as pl
from jax.experimental.pallas import tpu as pltpu


def _entropy_loss_kernel(x_ref, o_ref, acc_ref, *, scale, valid_b, tb):
    i = pl.program_id(0)

    @pl.when(i == 0)
    def _init():
        acc_ref[0, 0] = jnp.float32(0.0)

    # Block is [C, TB]: classes on sublanes, batch samples on lanes (dense).
    x = x_ref[...].astype(jnp.float32)

    # Numerically-stable softmax pieces along the class axis (axis 0).
    m = jnp.max(x, axis=0, keepdims=True)            # (1, TB)
    z = x - m
    ez = jnp.exp(z)
    s1 = jnp.sum(ez, axis=0, keepdims=True)          # (1, TB)  sum exp
    s2 = jnp.sum(ez * z, axis=0, keepdims=True)      # (1, TB)  sum exp * z

    # Per-sample sum_j p_j * log p_j == s2 / s1 - log(s1); reciprocal on EUP.
    ent = s2 * pl.reciprocal(s1, approx=True) - jnp.log(s1)

    # Mask out padded batch columns so they contribute nothing to the sum.
    col = i * tb + jax.lax.broadcasted_iota(jnp.int32, (1, tb), 1)
    ent = jnp.where(col < valid_b, ent, 0.0)

    acc_ref[0, 0] += jnp.sum(ent)

    @pl.when(i == pl.num_programs(0) - 1)
    def _finalize():
        # scale = -entmin_weight / (B * C) folded into one constant.
        o_ref[0, 0] = scale * acc_ref[0, 0]


def entropy_loss(x, entmin_weight=1.0, tb_max=512):
    """Pallas EntropyLoss.forward for 2-D logits [B, C] (softmax over dim=1)."""
    b, c = x.shape

    lane = 128
    bp = pl.cdiv(b, lane) * lane          # pad batch up to a lane multiple
    tb = min(int(tb_max), bp)             # batch (lane) tile size
    bp = pl.cdiv(bp, tb) * tb             # and up to a tile multiple
    n_tiles = bp // tb

    xt = jnp.transpose(x)                 # [C, B]: batch lane-dense
    if bp != b:
        xt = jnp.pad(xt, ((0, 0), (0, bp - b)))

    kernel = functools.partial(
        _entropy_loss_kernel,
        scale=-float(entmin_weight) / float(b * c),   # fold weight + mean
        valid_b=b,
        tb=tb,
    )
    out = pl.pallas_call(
        kernel,
        out_shape=jax.ShapeDtypeStruct((1, 1), jnp.float32),
        grid_spec=pltpu.PrefetchScalarGridSpec(
            num_scalar_prefetch=0,
            grid=(n_tiles,),
            # Last block dim is a 128-multiple; second-last equals the full C.
            in_specs=[pl.BlockSpec((c, tb), lambda i: (0, i))],
            out_specs=pl.BlockSpec(memory_space=pltpu.SMEM),
            scratch_shapes=[pltpu.SMEM((1, 1), jnp.float32)],
        ),
        compiler_params=pltpu.CompilerParams(
            # The batch-grid axis carries the scalar reduction -> sequential.
            dimension_semantics=("arbitrary",),
        ),
    )(xt)
    return out[0, 0]


def entropy_loss_ref(x, entmin_weight=1.0):
    """Pure-JAX reference matching the PyTorch module."""
    xf = x.astype(jnp.float32)
    sm = jax.nn.softmax(xf, axis=1)
    lsm = jax.nn.log_softmax(xf, axis=1)
    return -entmin_weight * jnp.mean(sm * lsm)


if __name__ == "__main__":
    key = jax.random.PRNGKey(0)

    # 5-class classifier logits, small batch (single tile, padded + masked).
    B, C = 8, 5
    x = jax.random.normal(key, (B, C), dtype=jnp.float32)
    out = jax.block_until_ready(entropy_loss(x, entmin_weight=1.0))
    ref = entropy_loss_ref(x, entmin_weight=1.0)
    # pl.reciprocal(approx=True) introduces ~2^-12 relative error in the loss.
    assert jnp.allclose(out, ref, atol=1e-5, rtol=2e-3), (out, ref)

    # Multi-tile + batch-padding path (2 grid steps at TB=512, 324 masked cols).
    B2 = 700
    x2 = jax.random.normal(jax.random.PRNGKey(1), (B2, C), dtype=jnp.float32)
    out2 = jax.block_until_ready(entropy_loss(x2, entmin_weight=0.5))
    ref2 = entropy_loss_ref(x2, entmin_weight=0.5)
    assert jnp.allclose(out2, ref2, atol=1e-5, rtol=2e-3), (out2, ref2)

    print("KERNEL_OK")
</pallas_src>

<mosaic_0001>
module attributes {stable_mosaic.version = 11 : i64} {
  func.func @_entropy_loss_kernel(%arg0: i32, %arg1: memref<5x128xf32, #tpu.memory_space<vmem>>, %arg2: memref<1x1xf32, #tpu.memory_space<smem>>, %arg3: memref<1x1xf32, #tpu.memory_space<smem>>) attributes {dimension_semantics = [#tpu.dimension_semantics<arbitrary>], iteration_bounds = array<i64: 1>, scalar_prefetch = 0 : i64, scratch_operands = 1 : i64, tpu.core_type = #tpu.core_type<tc>, window_params = [{transform_indices = @transform_0, window_bounds = array<i64: 5, 128>}, {transform_indices = @transform_1, window_bounds = array<i64: 1, 1>}]} {
    %c0_i32 = arith.constant 0 : i32
    %0 = arith.cmpi eq, %arg0, %c0_i32 : i32
    %1 = arith.extui %0 : i1 to i32
    %c0_i32_0 = arith.constant 0 : i32
    %2 = arith.cmpi ne, %1, %c0_i32_0 : i32
    scf.if %2 {
      %cst_12 = arith.constant 0.000000e+00 : f32
      %c0_13 = arith.constant 0 : index
      %c0_14 = arith.constant 0 : index
      %36 = memref.load %arg3[%c0_13, %c0_14] : memref<1x1xf32, #tpu.memory_space<smem>>
      memref.store %cst_12, %arg3[%c0_13, %c0_14] : memref<1x1xf32, #tpu.memory_space<smem>>
    } else {
    }
    %c0 = arith.constant 0 : index
    %c0_1 = arith.constant 0 : index
    %3 = vector.load %arg1[%c0, %c0_1] : memref<5x128xf32, #tpu.memory_space<vmem>>, vector<5x128xf32>
    %cst = arith.constant dense<0xFF800000> : vector<128xf32>
    %4 = vector.multi_reduction <maximumf>, %3, %cst [0] : vector<5x128xf32> to vector<128xf32>
    %5 = vector.shape_cast %4 : vector<128xf32> to vector<1x128xf32>
    %6 = vector.broadcast %5 : vector<1x128xf32> to vector<5x128xf32>
    %7 = arith.subf %3, %6 : vector<5x128xf32>
    %8 = math.exp %7 : vector<5x128xf32>
    %cst_2 = arith.constant dense<0.000000e+00> : vector<128xf32>
    %9 = vector.multi_reduction <add>, %8, %cst_2 [0] : vector<5x128xf32> to vector<128xf32>
    %10 = vector.shape_cast %9 : vector<128xf32> to vector<1x128xf32>
    %11 = arith.mulf %8, %7 : vector<5x128xf32>
    %cst_3 = arith.constant dense<0.000000e+00> : vector<128xf32>
    %12 = vector.multi_reduction <add>, %11, %cst_3 [0] : vector<5x128xf32> to vector<128xf32>
    %13 = vector.shape_cast %12 : vector<128xf32> to vector<1x128xf32>
    %14 = tpu.reciprocal %10 {approx = true} : vector<1x128xf32> -> vector<1x128xf32>
    %15 = arith.mulf %13, %14 : vector<1x128xf32>
    %16 = math.log %10 : vector<1x128xf32>
    %17 = arith.subf %15, %16 : vector<1x128xf32>
    %c128_i32 = arith.constant 128 : i32
    %18 = arith.muli %arg0, %c128_i32 : i32
    %19 = tpu.iota {dimensions = array<i32: 1>} : vector<1x128xi32>
    %20 = vector.broadcast %18 : i32 to vector<1x128xi32>
    %21 = arith.addi %20, %19 : vector<1x128xi32>
    %c8_i32 = arith.constant 8 : i32
    %22 = vector.broadcast %c8_i32 : i32 to vector<1x128xi32>
    %23 = arith.cmpi slt, %21, %22 : vector<1x128xi32>
    %cst_4 = arith.constant 0.000000e+00 : f32
    %24 = vector.broadcast %cst_4 : f32 to vector<1x128xf32>
    %25 = arith.select %23, %17, %24 : vector<1x128xi1>, vector<1x128xf32>
    %c0_5 = arith.constant 0 : index
    %c0_6 = arith.constant 0 : index
    %26 = memref.load %arg3[%c0_5, %c0_6] : memref<1x1xf32, #tpu.memory_space<smem>>
    %27 = vector.shape_cast %25 : vector<1x128xf32> to vector<1x1x128xf32>
    %cst_7 = arith.constant dense<0.000000e+00> : vector<1xf32>
    %28 = vector.multi_reduction <add>, %27, %cst_7 [1, 2] : vector<1x1x128xf32> to vector<1xf32>
    %29 = vector.shape_cast %28 : vector<1xf32> to vector<1x1x1xf32>
    %30 = vector.extract %29[0, 0, 0] : f32 from vector<1x1x1xf32>
    %31 = arith.addf %26, %30 : f32
    %c0_8 = arith.constant 0 : index
    %c0_9 = arith.constant 0 : index
    %32 = memref.load %arg3[%c0_8, %c0_9] : memref<1x1xf32, #tpu.memory_space<smem>>
    memref.store %31, %arg3[%c0_8, %c0_9] : memref<1x1xf32, #tpu.memory_space<smem>>
    %c0_i32_10 = arith.constant 0 : i32
    %33 = arith.cmpi eq, %arg0, %c0_i32_10 : i32
    %34 = arith.extui %33 : i1 to i32
    %c0_i32_11 = arith.constant 0 : i32
    %35 = arith.cmpi ne, %34, %c0_i32_11 : i32
    scf.if %35 {
      %c0_12 = arith.constant 0 : index
      %c0_13 = arith.constant 0 : index
      %36 = memref.load %arg3[%c0_12, %c0_13] : memref<1x1xf32, #tpu.memory_space<smem>>
      %cst_14 = arith.constant -2.500000e-02 : f32
      %37 = arith.mulf %cst_14, %36 : f32
      %c0_15 = arith.constant 0 : index
      %c0_16 = arith.constant 0 : index
      %38 = memref.load %arg2[%c0_15, %c0_16] : memref<1x1xf32, #tpu.memory_space<smem>>
      memref.store %37, %arg2[%c0_15, %c0_16] : memref<1x1xf32, #tpu.memory_space<smem>>
    } else {
    }
    return
  }
  func.func @transform_0(%arg0: i32) -> (i32, i32) {
    %c0_i32 = arith.constant 0 : i32
    %c0_i32_0 = arith.constant 0 : i32
    return %c0_i32, %arg0 : i32, i32
  }
  func.func @transform_1(%arg0: i32) -> (i32, i32) {
    %c0_i32 = arith.constant 0 : i32
    %c0_i32_0 = arith.constant 0 : i32
    %c0_i32_1 = arith.constant 0 : i32
    return %c0_i32, %c0_i32_0 : i32, i32
  }
}

</mosaic_0001>

<bundles_post_ra>
// kernel: tpu_custom_call.1
= control target key start
LH: loop header
LB: loop body
LE: loop exit
PB: predicated region body
PF: predicated region fallthrough
CT: control target
= control target key end

     0   :  { %6 = vsyncpa [#allocation4], 0  ;;  %s177_s0 = inlined_call_operand.hbm [shape: f32[5,128], index: 0, kind: input, shape index: {}]   ;;  %s178_s1 = inlined_call_operand.hbm [shape: f32[1,1], index: 1, kind: output, shape index: {}]  }
   0x1   :  { %7 = vsyncpa [#allocation5], 0  ;;  %s13_s8 = sshll.u32 %s177_s0, 4  ;;  %s156_s9 = smov [#allocation3]   ;;  %s14_s8 = int_to_ptr.hbm [resolvable:$true] %s13_s8 }
   0x2   :  { %s15_s10 = sshll.u32 %s156_s9, 4  ;;  %s16_s10 = int_to_ptr.vmem [resolvable:$true] %s15_s10 }
   0x3   :  { %18 = dma.hbm_to_vmem [thread:$0]  %s14_s8, 128, %s16_s10, [#allocation4]  }
   0x4   :  { %152 = dma.done.wait [#allocation4], 128  }
   0x5   :  { %153 = vsyncadd [#allocation4], 4294967168  ;;  %vm30_vm0 = vcmask 1044480   ;;  %v29_v0 = vld [vmem:[#allocation3] sm:$0x1f]  ;;  %v62_v25 = vlaneseq  ;;  %vm69_vm2 = vcmask 1040384  }
   0x6   :  { %v31_v1 = vsel %vm30_vm0, %v29_v0, -inf  ;;  %s95_s12 = sshll.u32 %s178_s1, 4  ;;  %s157_s15 = smov [#allocation6]   ;;  %s96_s12 = int_to_ptr.hbm [resolvable:$true] %s95_s12 }
   0x7   :  { %v32_v2 = vrot.slane %v31_v1, 4  ;;  %v63_v27 = vand.u32 127, %v62_v25 }
   0x9   :  { %v33_v3 = vmax.f32 %v31_v1, %v32_v2  ;;  %vm66_vm1 = vcmp.lt.s32.totalorder %v63_v27, 8 }
   0xb   :  { %v34_v4 = vrot.slane %v33_v3, 2 }
   0xd   :  { %v35_v5 = vmax.f32 %v33_v3, %v34_v4 }
   0xf   :  { %v36_v6 = vrot.slane %v35_v5, 1 }
  0x11   :  { %v37_v7 = vmax.f32 %v35_v5, %v36_v6 }
  0x13   :  { %v38_v8 = vsub.f32 %v29_v0, %v37_v7 }
  0x15   :  { %v39_v9 = vmul.f32 1.442695, %v38_v8 }
  0x17   :  { %110 = vpow2.f32 %v39_v9 }
  0x1d   :  { %v111_v10 = vpop.eup %110 }
  0x1e   :  { %v41_v11 = vsel %vm30_vm0, %v111_v10, 0.0  ;;  %v48_v12 = vmul.f32 %v111_v10, %v38_v8 }
  0x1f   :  { %v42_v13 = vrot.slane %v41_v11, 4 }
  0x20   :  { %v49_v14 = vsel %vm30_vm0, %v48_v12, 0.0 }
  0x21   :  { %v43_v15 = vadd.f32 %v42_v13, %v41_v11  ;;  %v50_v16 = vrot.slane %v49_v14, 4 }
  0x23   :  { %v44_v17 = vrot.slane %v43_v15, 2  ;;  %v51_v18 = vadd.f32 %v50_v16, %v49_v14 }
  0x25   :  { %v45_v19 = vadd.f32 %v44_v17, %v43_v15  ;;  %v52_v20 = vrot.slane %v51_v18, 2 }
  0x27   :  { %v46_v21 = vrot.slane %v45_v19, 1  ;;  %v53_v22 = vadd.f32 %v52_v20, %v51_v18 }
  0x29   :  { %v47_v23 = vadd.f32 %v46_v21, %v45_v19  ;;  %v54_v24 = vrot.slane %v53_v22, 1 }
  0x2b   :  { %112 = vrcp.f32 %v47_v23  ;;  %v55_v26 = vadd.f32 %v54_v24, %v53_v22 }
  0x2c   :  { %114 = vlog2.f32 %v47_v23 }
  0x31   :  { %v113_v28 = vpop.eup %112 }
  0x32   :  { %v115_v29 = vpop.eup %114  ;;  %v57_v30 = vmul.f32 %v113_v28, %v55_v26 }
  0x33   :  { %v59_v31 = vmul.f32 0.6931472, %v115_v29 }
  0x35   :  { %v60_v32 = vsub.f32 %v57_v30, %v59_v31 }
  0x37   :  { %v67_v33 = vsel %vm66_vm1, %v60_v32, 0.0 }
  0x38   :  { %v70_v34 = vsel %vm69_vm2, %v67_v33, 0.0 }
  0x39   :  { %71 = vadd.xlane.f32.xlu0 %v70_v34 }
  0xac   :  { %v72_v35 = vpop.xlane.xlu0 %71 }
  0xad   :  { %v73_v36 = vrot.slane %v72_v35, 4 }
  0xaf   :  { %v74_v37 = vadd.f32 %v73_v36, %v72_v35 }
  0xb1   :  { %v75_v38 = vrot.slane %v74_v37, 2 }
  0xb3   :  { %v76_v39 = vadd.f32 %v75_v38, %v74_v37 }
  0xb5   :  { %v77_v40 = vrot.slane %v76_v39, 1 }
  0xb7   :  { %v78_v41 = vadd.f32 %v77_v40, %v76_v39 }
  0xb9   :  { %106 = vpush %v78_v41 }
  0xea   :  { %s107_s13 = spop %106 }
  0xeb   :  { %s87_s14 = smul.f32 -0.025, %s107_s13 }
  0xed   :  { %89 = sst [smem:[#allocation6]] %s87_s14 }
  0xee   :  { %98 = dma.smem_to_hbm %s157_s15, 16, %s96_s12, [#allocation5]  }
  0xef   :  { %154 = dma.done.wait [#allocation5], 16  }
  0xf0   :  { %155 = vsyncadd [#allocation5], 4294967280 }
  0xf1   :  { %103 = sfence }
  0xf2   :  { %104 = vsyncpa [#allocation4], 1 }
  0xf3   :  { %105 = vsyncpa [#allocation5], 1 }

</bundles_post_ra>
